<compile_context>
chip_gen: v5e
topology: v5e:2x2
jax: 0.10.0
libtpu: 0.0.40
codegen_flags: <defaults>
</compile_context>

<pallas_src>
import functools

import jax
import jax.numpy as jnp
from jax.experimental import pallas as pl
from jax.experimental.pallas import tpu as pltpu

LOG_STD_MAX = 2.0
LOG_STD_MIN = -5.0

# Keep double-buffered tiles + live activations under this so v7x (64 MiB VMEM) is safe.
_VMEM_SAFE_BYTES = 40 << 20


def _round_up(x, m):
    return ((x + m - 1) // m) * m


def _vmem_footprint(tb, obs_dim, hidden, act_dim):
    tile_io = 2 * (tb * obs_dim * 4 + tb * act_dim * 4)            # double-buffered obs/mean
    weights = 2 * 2 * (obs_dim * hidden + hidden * hidden + hidden * act_dim)  # bf16, 2 bufs
    biases = 2 * 4 * (2 * hidden + act_dim)                        # f32, 2 bufs
    acts = 3 * tb * hidden * 4                                     # live f32 hidden activations
    return tile_io + weights + biases + acts


def gaussian_policy_kernel(x_ref, w0_ref, b0_ref, w1_ref, b1_ref, w2_ref, b2_ref,
                           mean_ref):
    # Hidden layer 0: Linear (bf16 MXU, f32 acc) + bias + ReLU in f32.
    x = x_ref[...].astype(jnp.bfloat16)
    h = jnp.dot(x, w0_ref[...], preferred_element_type=jnp.float32) + b0_ref[...]
    h = jnp.maximum(h, 0.0)
    # Hidden layer 1.
    h = jnp.dot(h.astype(jnp.bfloat16), w1_ref[...],
                preferred_element_type=jnp.float32) + b1_ref[...]
    h = jnp.maximum(h, 0.0)
    # Output layer (identity activation) -> distribution mean, unpadded act_dim columns.
    mean_ref[...] = (jnp.dot(h.astype(jnp.bfloat16), w2_ref[...],
                             preferred_element_type=jnp.float32)
                     + b2_ref[...]).astype(mean_ref.dtype)


@functools.partial(jax.jit, static_argnames=("block_b", "core_parallel"))
def gaussian_policy_forward(obs, w0, b0, w1, b1, w2, b2, log_std, *,
                            block_b=2048, core_parallel=False):
    """Returns (mean, std): parameters of the MultivariateNormal in the PyTorch module.

    Weights are (in_features, out_features) so the kernel computes x @ W + b, which is
    equivalent to PyTorch's x @ W.T + b with W stored as (out, in).
    Set core_parallel=True on v7x (with >= 2 batch tiles) to split the grid across both
    TensorCores; leave False on single-TC v5e/v6e.
    """
    B, obs_dim = obs.shape
    hidden = w0.shape[1]
    act_dim = w2.shape[1]

    # std = exp(clamp(log_std)) is batch independent -> computed in XLA, not the kernel.
    std = jnp.exp(jnp.clip(log_std, LOG_STD_MIN, LOG_STD_MAX)).astype(jnp.float32)

    # bf16 weights for the MXU; biases stay f32 for the VPU adds.
    w0b = w0.astype(jnp.bfloat16)
    w1b = w1.astype(jnp.bfloat16)
    w2b = w2.astype(jnp.bfloat16)
    b0r = b0.reshape(1, hidden).astype(jnp.float32)
    b1r = b1.reshape(1, hidden).astype(jnp.float32)
    b2r = b2.reshape(1, act_dim).astype(jnp.float32)

    # Batch tile: multiple of 8 sublanes, no bigger than needed, capped for v7x VMEM.
    tb = min(block_b, _round_up(B, 8))
    tb = max(8, (tb // 8) * 8)
    while _vmem_footprint(tb, obs_dim, hidden, act_dim) > _VMEM_SAFE_BYTES and tb > 256:
        tb //= 2
    grid = (pl.cdiv(B, tb),)   # ragged last tile handled by Pallas edge masking, no jnp.pad

    vmem_bytes = int(_vmem_footprint(tb, obs_dim, hidden, act_dim) + (4 << 20))

    weight_bytes = 2 * (obs_dim * hidden + hidden * hidden + hidden * act_dim) \
        + 4 * (2 * hidden + act_dim)
    cost = pl.CostEstimate(
        flops=2 * B * (obs_dim * hidden + hidden * hidden + hidden * act_dim),
        transcendentals=0,
        bytes_accessed=B * obs_dim * 4 + B * act_dim * 4 + weight_bytes)

    def resident(shape):
        # Constant index map -> weight/bias stays VMEM-resident across grid steps.
        return pl.BlockSpec(shape, lambda i, _n=len(shape): (0,) * _n)

    dim_sem = (pltpu.CORE_PARALLEL,) if core_parallel else ("parallel",)

    mean = pl.pallas_call(
        gaussian_policy_kernel,
        out_shape=jax.ShapeDtypeStruct((B, act_dim), jnp.float32),
        grid=grid,
        in_specs=[
            pl.BlockSpec((tb, obs_dim), lambda i: (i, 0)),   # batch-tiled obs
            resident(w0b.shape), resident(b0r.shape),        # VMEM-resident weights
            resident(w1b.shape), resident(b1r.shape),
            resident(w2b.shape), resident(b2r.shape),
        ],
        out_specs=pl.BlockSpec((tb, act_dim), lambda i: (i, 0)),
        compiler_params=pltpu.CompilerParams(
            dimension_semantics=dim_sem,
            vmem_limit_bytes=vmem_bytes),
        cost_estimate=cost,
    )(obs, w0b, b0r, w1b, b1r, w2b, b2r)

    return mean, std


def init_params(key, obs_dim, act_dim, hidden_dim):
    """Deterministic PyTorch-Linear-style init (U(-1/sqrt(fan_in), 1/sqrt(fan_in)))."""
    sizes = [obs_dim, hidden_dim, hidden_dim, act_dim]
    params = []
    for fan_in, fan_out in zip(sizes[:-1], sizes[1:]):
        key, kw, kb = jax.random.split(key, 3)
        bound = 1.0 / jnp.sqrt(jnp.float32(fan_in))
        w = jax.random.uniform(kw, (fan_in, fan_out), jnp.float32, -bound, bound)
        b = jax.random.uniform(kb, (fan_out,), jnp.float32, -bound, bound)
        params += [w, b]
    log_std = jnp.zeros((act_dim,), jnp.float32)  # nn.Parameter(torch.zeros(act_dim))
    return params, log_std


def reference_forward_f32(obs, w0, b0, w1, b1, w2, b2, log_std):
    h = jnp.maximum(obs @ w0 + b0, 0.0)
    h = jnp.maximum(h @ w1 + b1, 0.0)
    mean = h @ w2 + b2
    std = jnp.exp(jnp.clip(log_std, LOG_STD_MIN, LOG_STD_MAX))
    return mean, std


def reference_forward_bf16(obs, w0, b0, w1, b1, w2, b2, log_std):
    """Same math as the kernel: bf16 matmul inputs, f32 accumulation / elementwise."""
    bf = jnp.bfloat16
    h = jnp.dot(obs.astype(bf), w0.astype(bf),
                preferred_element_type=jnp.float32) + b0
    h = jnp.maximum(h, 0.0)
    h = jnp.dot(h.astype(bf), w1.astype(bf),
                preferred_element_type=jnp.float32) + b1
    h = jnp.maximum(h, 0.0)
    mean = jnp.dot(h.astype(bf), w2.astype(bf),
                   preferred_element_type=jnp.float32) + b2
    std = jnp.exp(jnp.clip(log_std, LOG_STD_MIN, LOG_STD_MAX))
    return mean, std


if __name__ == "__main__":
    # Small shapes consistent with the module's MLP forward (hidden_dim default 256).
    B, OBS_DIM, ACT_DIM, HIDDEN = 8, 16, 8, 256

    key = jax.random.PRNGKey(0)
    key, k_obs, k_obs2 = jax.random.split(key, 3)
    obs = jax.random.normal(k_obs, (B, OBS_DIM), jnp.float32)

    (w0, b0, w1, b1, w2, b2), log_std = init_params(key, OBS_DIM, ACT_DIM, HIDDEN)

    mean, std = gaussian_policy_forward(obs, w0, b0, w1, b1, w2, b2, log_std)
    jax.block_until_ready((mean, std))

    assert mean.shape == (B, ACT_DIM), mean.shape
    assert std.shape == (ACT_DIM,), std.shape

    # Correctness: tight check vs a bf16-matmul reference (same math as the kernel),
    # loose check vs the full-f32 PyTorch-equivalent reference.
    ref_mean_bf16, ref_std = reference_forward_bf16(obs, w0, b0, w1, b1, w2, b2, log_std)
    ref_mean_f32, _ = reference_forward_f32(obs, w0, b0, w1, b1, w2, b2, log_std)
    assert jnp.allclose(mean, ref_mean_bf16, atol=5e-4, rtol=5e-4), "mean mismatch (bf16 ref)"
    assert jnp.allclose(mean, ref_mean_f32, atol=2e-2, rtol=2e-2), "mean mismatch (f32 ref)"
    assert jnp.allclose(std, ref_std, atol=1e-6, rtol=1e-6), "std mismatch"

    # Exercise the ragged-last-tile path (B not a multiple of the batch tile, no jnp.pad).
    B2 = 24
    obs2 = jax.random.normal(k_obs2, (B2, OBS_DIM), jnp.float32)
    mean2, std2 = gaussian_policy_forward(obs2, w0, b0, w1, b1, w2, b2, log_std,
                                          block_b=16)
    jax.block_until_ready((mean2, std2))
    assert mean2.shape == (B2, ACT_DIM), mean2.shape
    ref_mean2, _ = reference_forward_bf16(obs2, w0, b0, w1, b1, w2, b2, log_std)
    assert jnp.allclose(mean2, ref_mean2, atol=5e-4, rtol=5e-4), "ragged-tile mean mismatch"

    # TODO(synk): the MultivariateNormal distribution object / .sample() has no Pallas
    # equivalent; the kernel returns the distribution parameters (mean, diag std) instead.
    print("KERNEL_OK")
</pallas_src>

<mosaic_0001>
module attributes {stable_mosaic.version = 11 : i64} {
  func.func @gaussian_policy_kernel(%arg0: i32, %arg1: memref<8x16xf32, #tpu.memory_space<vmem>>, %arg2: memref<16x256xbf16, #tpu.memory_space<vmem>>, %arg3: memref<1x256xf32, #tpu.memory_space<vmem>>, %arg4: memref<256x256xbf16, #tpu.memory_space<vmem>>, %arg5: memref<1x256xf32, #tpu.memory_space<vmem>>, %arg6: memref<256x8xbf16, #tpu.memory_space<vmem>>, %arg7: memref<1x8xf32, #tpu.memory_space<vmem>>, %arg8: memref<8x8xf32, #tpu.memory_space<vmem>>) attributes {dimension_semantics = [#tpu.dimension_semantics<parallel>], iteration_bounds = array<i64: 1>, scalar_prefetch = 0 : i64, scratch_operands = 0 : i64, tpu.core_type = #tpu.core_type<tc>, window_params = [{transform_indices = @transform_0, window_bounds = array<i64: 8, 16>}, {pipeline_mode = #tpu.pipeline_mode<synchronous>, transform_indices = @transform_1, window_bounds = array<i64: 16, 256>}, {pipeline_mode = #tpu.pipeline_mode<synchronous>, transform_indices = @transform_2, window_bounds = array<i64: 1, 256>}, {pipeline_mode = #tpu.pipeline_mode<synchronous>, transform_indices = @transform_3, window_bounds = array<i64: 256, 256>}, {pipeline_mode = #tpu.pipeline_mode<synchronous>, transform_indices = @transform_4, window_bounds = array<i64: 1, 256>}, {pipeline_mode = #tpu.pipeline_mode<synchronous>, transform_indices = @transform_5, window_bounds = array<i64: 256, 8>}, {pipeline_mode = #tpu.pipeline_mode<synchronous>, transform_indices = @transform_6, window_bounds = array<i64: 1, 8>}, {transform_indices = @transform_7, window_bounds = array<i64: 8, 8>}]} {
    %c0 = arith.constant 0 : index
    %c0_0 = arith.constant 0 : index
    %0 = vector.load %arg1[%c0, %c0_0] : memref<8x16xf32, #tpu.memory_space<vmem>>, vector<8x16xf32>
    %1 = arith.truncf %0 : vector<8x16xf32> to vector<8x16xbf16>
    %c0_1 = arith.constant 0 : index
    %c0_2 = arith.constant 0 : index
    %2 = vector.load %arg2[%c0_1, %c0_2] : memref<16x256xbf16, #tpu.memory_space<vmem>>, vector<16x256xbf16>
    %cst = arith.constant dense<0.000000e+00> : vector<8x256xf32>
    %3 = tpu.matmul %1, %2, %cst {dimension_numbers = #tpu.dot_dimension_numbers<[1], [0], [0], [1], [0, 0, 1, 1], [], []>} : vector<8x16xbf16>, vector<16x256xbf16>, vector<8x256xf32> -> vector<8x256xf32>
    %c0_3 = arith.constant 0 : index
    %c0_4 = arith.constant 0 : index
    %4 = vector.load %arg3[%c0_3, %c0_4] : memref<1x256xf32, #tpu.memory_space<vmem>>, vector<1x256xf32>
    %5 = vector.broadcast %4 : vector<1x256xf32> to vector<8x256xf32>
    %6 = arith.addf %3, %5 : vector<8x256xf32>
    %cst_5 = arith.constant 0.000000e+00 : f32
    %7 = vector.broadcast %cst_5 : f32 to vector<8x256xf32>
    %8 = arith.maximumf %6, %7 : vector<8x256xf32>
    %9 = arith.truncf %8 : vector<8x256xf32> to vector<8x256xbf16>
    %c0_6 = arith.constant 0 : index
    %c0_7 = arith.constant 0 : index
    %10 = vector.load %arg4[%c0_6, %c0_7] : memref<256x256xbf16, #tpu.memory_space<vmem>>, vector<256x256xbf16>
    %cst_8 = arith.constant dense<0.000000e+00> : vector<8x256xf32>
    %11 = tpu.matmul %9, %10, %cst_8 {dimension_numbers = #tpu.dot_dimension_numbers<[1], [0], [0], [1], [0, 0, 1, 1], [], []>} : vector<8x256xbf16>, vector<256x256xbf16>, vector<8x256xf32> -> vector<8x256xf32>
    %c0_9 = arith.constant 0 : index
    %c0_10 = arith.constant 0 : index
    %12 = vector.load %arg5[%c0_9, %c0_10] : memref<1x256xf32, #tpu.memory_space<vmem>>, vector<1x256xf32>
    %13 = vector.broadcast %12 : vector<1x256xf32> to vector<8x256xf32>
    %14 = arith.addf %11, %13 : vector<8x256xf32>
    %cst_11 = arith.constant 0.000000e+00 : f32
    %15 = vector.broadcast %cst_11 : f32 to vector<8x256xf32>
    %16 = arith.maximumf %14, %15 : vector<8x256xf32>
    %17 = arith.truncf %16 : vector<8x256xf32> to vector<8x256xbf16>
    %c0_12 = arith.constant 0 : index
    %c0_13 = arith.constant 0 : index
    %18 = vector.load %arg6[%c0_12, %c0_13] : memref<256x8xbf16, #tpu.memory_space<vmem>>, vector<256x8xbf16>
    %cst_14 = arith.constant dense<0.000000e+00> : vector<8x8xf32>
    %19 = tpu.matmul %17, %18, %cst_14 {dimension_numbers = #tpu.dot_dimension_numbers<[1], [0], [0], [1], [0, 0, 1, 1], [], []>} : vector<8x256xbf16>, vector<256x8xbf16>, vector<8x8xf32> -> vector<8x8xf32>
    %c0_15 = arith.constant 0 : index
    %c0_16 = arith.constant 0 : index
    %20 = vector.load %arg7[%c0_15, %c0_16] : memref<1x8xf32, #tpu.memory_space<vmem>>, vector<1x8xf32>
    %21 = vector.broadcast %20 : vector<1x8xf32> to vector<8x8xf32>
    %22 = arith.addf %19, %21 : vector<8x8xf32>
    %c0_17 = arith.constant 0 : index
    %c0_18 = arith.constant 0 : index
    %23 = vector.load %arg8[%c0_17, %c0_18] : memref<8x8xf32, #tpu.memory_space<vmem>>, vector<8x8xf32>
    tpu.vector_store %arg8[%c0_17, %c0_18], %22 {strides = array<i32>} : memref<8x8xf32, #tpu.memory_space<vmem>>, vector<8x8xf32>,
    return
  }
  func.func @transform_0(%arg0: i32) -> (i32, i32) {
    %c0_i32 = arith.constant 0 : i32
    %c0_i32_0 = arith.constant 0 : i32
    return %arg0, %c0_i32 : i32, i32
  }
  func.func @transform_1(%arg0: i32) -> (i32, i32) {
    %c0_i32 = arith.constant 0 : i32
    %c0_i32_0 = arith.constant 0 : i32
    %c0_i32_1 = arith.constant 0 : i32
    return %c0_i32, %c0_i32_0 : i32, i32
  }
  func.func @transform_2(%arg0: i32) -> (i32, i32) {
    %c0_i32 = arith.constant 0 : i32
    %c0_i32_0 = arith.constant 0 : i32
    %c0_i32_1 = arith.constant 0 : i32
    return %c0_i32, %c0_i32_0 : i32, i32
  }
  func.func @transform_3(%arg0: i32) -> (i32, i32) {
    %c0_i32 = arith.constant 0 : i32
    %c0_i32_0 = arith.constant 0 : i32
    %c0_i32_1 = arith.constant 0 : i32
    return %c0_i32, %c0_i32_0 : i32, i32
  }
  func.func @transform_4(%arg0: i32) -> (i32, i32) {
    %c0_i32 = arith.constant 0 : i32
    %c0_i32_0 = arith.constant 0 : i32
    %c0_i32_1 = arith.constant 0 : i32
    return %c0_i32, %c0_i32_0 : i32, i32
  }
  func.func @transform_5(%arg0: i32) -> (i32, i32) {
    %c0_i32 = arith.constant 0 : i32
    %c0_i32_0 = arith.constant 0 : i32
    %c0_i32_1 = arith.constant 0 : i32
    return %c0_i32, %c0_i32_0 : i32, i32
  }
  func.func @transform_6(%arg0: i32) -> (i32, i32) {
    %c0_i32 = arith.constant 0 : i32
    %c0_i32_0 = arith.constant 0 : i32
    %c0_i32_1 = arith.constant 0 : i32
    return %c0_i32, %c0_i32_0 : i32, i32
  }
  func.func @transform_7(%arg0: i32) -> (i32, i32) {
    %c0_i32 = arith.constant 0 : i32
    %c0_i32_0 = arith.constant 0 : i32
    return %arg0, %c0_i32 : i32, i32
  }
}

</mosaic_0001>

<bundles_post_ra>
// kernel: gaussian_policy_forward.1
= control target key start
LH: loop header
LB: loop body
LE: loop exit
PB: predicated region body
PF: predicated region fallthrough
CT: control target
= control target key end

     0   :  { %vm48_vm0 = vcmask 130048   ;;  %s1102_s0 = inlined_call_operand.vmem [shape: f32[8,16], index: 0, kind: input, shape index: {}]   ;;  %s1103_s1 = inlined_call_operand.vmem [shape: bf16[16,256], index: 1, kind: input, shape index: {}]   ;;  %s1104_s2 = inlined_call_operand.vmem [shape: f32[1,256], index: 2, kind: input, shape index: {}]   ;;  %s1105_s3 = inlined_call_operand.vmem [shape: bf16[256,256], index: 3, kind: input, shape index: {}]   ;;  %s1106_s4 = inlined_call_operand.vmem [shape: f32[1,256], index: 4, kind: input, shape index: {}]   ;;  %s1107_s5 = inlined_call_operand.vmem [shape: bf16[256,8], index: 5, kind: input, shape index: {}]   ;;  %s1108_s6 = inlined_call_operand.vmem [shape: f32[1,8], index: 6, kind: input, shape index: {}]   ;;  %s1109_s7 = inlined_call_operand.hbm [shape: f32[8,8], index: 7, kind: output, shape index: {}]  }
   0x1   :  { %v514_v0 = vld [vmem:[%s1103_s1] sm:$0xf]  ;;  %v715_v1 = vld [vmem:[%s1103_s1 + $0x4] sm:$0xf0]  ;;  %v714_v2 = vld [vmem:[%s1103_s1 + $0x4] sm:$0xf] }
   0x2   :  { %v515_v3 = vor.u32 %v715_v1, %v514_v0  ;;  %v516_v4 = vld [vmem:[%s1103_s1 + $0x8] sm:$0xf0]  ;;  %v28_v5 = vld [vmem:[%s1102_s0] sm:$0xff]  ;;  %v580_v6 = vld [vmem:[%s1105_s3 + $0x70] sm:$0xf] }
   0x3   :  { %v519_v7 = vor.u32 %v714_v2, %v516_v4  ;;  %v29_v8 = vpack.c.bf16 %v28_v5, %v28_v5  ;;  %v731_v9 = vld [vmem:[%s1105_s3 + $0x74] sm:$0xf0]  ;;  %v644_v10 = vld [vmem:[%s1105_s3 + $0xf0] sm:$0xf]  ;;  %v730_v14 = vld [vmem:[%s1105_s3 + $0x74] sm:$0xf] }
   0x4   :  { %v747_v11 = vld [vmem:[%s1105_s3 + $0xf4] sm:$0xf0]  ;;  %59 = vmatpush.bf16.msra.mxu0 %v515_v3  ;;  %v581_v12 = vor.u32 %v731_v9, %v580_v6  ;;  %v582_v15 = vld [vmem:[%s1105_s3 + $0x78] sm:$0xf0]  ;;  %v746_v16 = vld [vmem:[%s1105_s3 + $0xf4] sm:$0xf] }
   0x5   :  { %v645_v13 = vor.u32 %v747_v11, %v644_v10  ;;  %72 = vmatpush.bf16.msra.mxu1 %v519_v7  ;;  %v585_v17 = vor.u32 %v730_v14, %v582_v15  ;;  %v646_v18 = vld [vmem:[%s1105_s3 + $0xf8] sm:$0xf0]  ;;  %v572_v19 = vld [vmem:[%s1105_s3 + $0x60] sm:$0xf]  ;;  %v729_v20 = vld [vmem:[%s1105_s3 + $0x64] sm:$0xf0] }
   0x6   :  { %280 = vmatpush.bf16.msra.mxu2 %v581_v12  ;;  %v649_v21 = vor.u32 %v746_v16, %v646_v18  ;;  %v573_v22 = vor.u32 %v729_v20, %v572_v19  ;;  %v636_v23 = vld [vmem:[%s1105_s3 + $0xe0] sm:$0xf]  ;;  %v745_v24 = vld [vmem:[%s1105_s3 + $0xe4] sm:$0xf0]  ;;  %v728_v25 = vld [vmem:[%s1105_s3 + $0x64] sm:$0xf] }
   0x7   :  { %293 = vmatpush.bf16.msra.mxu3 %v645_v13  ;;  %520 = vmatmul.msk.bf16.vlgmr.msra.gmra.mxu0 %vm48_vm0, %v29_v8  ;;  %v637_v26 = vor.u32 %v745_v24, %v636_v23  ;;  %v574_v27 = vld [vmem:[%s1105_s3 + $0x68] sm:$0xf0]  ;;  %v744_v28 = vld [vmem:[%s1105_s3 + $0xe4] sm:$0xf]  ;;  %v564_v31 = vld [vmem:[%s1105_s3 + $0x50] sm:$0xf] }
   0x8   :  { %v638_v29 = vld [vmem:[%s1105_s3 + $0xe8] sm:$0xf0]  ;;  %521 = vmatmul.msk.bf16.vlgmr.msra.gmra.mxu1 %vm48_vm0, %v29_v8  ;;  %306 = vmatpush.bf16.msrb.mxu0 %v585_v17  ;;  %v577_v30 = vor.u32 %v728_v25, %v574_v27  ;;  %v727_v32 = vld [vmem:[%s1105_s3 + $0x54] sm:$0xf0]  ;;  %v628_v33 = vld [vmem:[%s1105_s3 + $0xd0] sm:$0xf] }
   0x9   :  { %319 = vmatpush.bf16.msrb.mxu1 %v649_v21  ;;  %v641_v34 = vor.u32 %v744_v28, %v638_v29  ;;  %v743_v35 = vld [vmem:[%s1105_s3 + $0xd4] sm:$0xf0]  ;;  %v726_v36 = vld [vmem:[%s1105_s3 + $0x54] sm:$0xf]  ;;  %v566_v37 = vld [vmem:[%s1105_s3 + $0x58] sm:$0xf0]  ;;  %v565_v38 = vor.u32 %v727_v32, %v564_v31 }
   0xa   :  { %281 = vmatpush.bf16.msra.mxu2 %v573_v22  ;;  %v629_v39 = vor.u32 %v743_v35, %v628_v33  ;;  %v742_v40 = vld [vmem:[%s1105_s3 + $0xd4] sm:$0xf]  ;;  %v630_v41 = vld [vmem:[%s1105_s3 + $0xd8] sm:$0xf0]  ;;  %v556_v42 = vld [vmem:[%s1105_s3 + $0x40] sm:$0xf]  ;;  %v569_v46 = vor.u32 %v726_v36, %v566_v37 }
   0xb   :  { %294 = vmatpush.bf16.msra.mxu3 %v637_v26  ;;  %v725_v43 = vld [vmem:[%s1105_s3 + $0x44] sm:$0xf0]  ;;  %v620_v44 = vld [vmem:[%s1105_s3 + $0xc0] sm:$0xf]  ;;  %v633_v47 = vor.u32 %v742_v40, %v630_v41  ;;  %v724_v48 = vld [vmem:[%s1105_s3 + $0x44] sm:$0xf] }
   0xc   :  { %v741_v45 = vld [vmem:[%s1105_s3 + $0xc4] sm:$0xf0]  ;;  %307 = vmatpush.bf16.msrb.mxu0 %v577_v30  ;;  %v558_v49 = vld [vmem:[%s1105_s3 + $0x48] sm:$0xf0]  ;;  %v557_v50 = vor.u32 %v725_v43, %v556_v42  ;;  %v740_v52 = vld [vmem:[%s1105_s3 + $0xc4] sm:$0xf] }
   0xd   :  { %320 = vmatpush.bf16.msrb.mxu1 %v641_v34  ;;  %v621_v51 = vor.u32 %v741_v45, %v620_v44  ;;  %v622_v53 = vld [vmem:[%s1105_s3 + $0xc8] sm:$0xf0]  ;;  %v548_v54 = vld [vmem:[%s1105_s3 + $0x30] sm:$0xf]  ;;  %v723_v55 = vld [vmem:[%s1105_s3 + $0x34] sm:$0xf0]  ;;  %v561_v58 = vor.u32 %v724_v48, %v558_v49 }
   0xe   :  { %282 = vmatpush.bf16.msra.mxu2 %v565_v38  ;;  %v612_v56 = vld [vmem:[%s1105_s3 + $0xb0] sm:$0xf]  ;;  %v739_v57 = vld [vmem:[%s1105_s3 + $0xb4] sm:$0xf0]  ;;  %v722_v59 = vld [vmem:[%s1105_s3 + $0x34] sm:$0xf]  ;;  %v625_v60 = vor.u32 %v740_v52, %v622_v53  ;;  %v549_v0 = vor.u32 %v723_v55, %v548_v54 }
   0xf   :  { %295 = vmatpush.bf16.msra.mxu3 %v629_v39  ;;  %v550_v61 = vld [vmem:[%s1105_s3 + $0x38] sm:$0xf0]  ;;  %v738_v62 = vld [vmem:[%s1105_s3 + $0xb4] sm:$0xf]  ;;  %v613_v1 = vor.u32 %v739_v57, %v612_v56  ;;  %v540_v2 = vld [vmem:[%s1105_s3 + $0x20] sm:$0xf] }
  0x10   :  { %308 = vmatpush.bf16.msrb.mxu0 %v569_v46  ;;  %v614_v63 = vld [vmem:[%s1105_s3 + $0xb8] sm:$0xf0]  ;;  %v721_v3 = vld [vmem:[%s1105_s3 + $0x24] sm:$0xf0]  ;;  %v604_v4 = vld [vmem:[%s1105_s3 + $0xa0] sm:$0xf] }
  0x11   :  { %321 = vmatpush.bf16.msrb.mxu1 %v633_v47  ;;  %v737_v5 = vld [vmem:[%s1105_s3 + $0xa4] sm:$0xf0] }
  0x12   :  { %283 = vmatpush.bf16.msra.mxu2 %v557_v50 }
  0x13   :  { %296 = vmatpush.bf16.msra.mxu3 %v621_v51 }
  0x14   :  { %12 = vsyncpa [#allocation3], 0  ;;  %309 = vmatpush.bf16.msrb.mxu0 %v561_v58  ;;  %v553_v6 = vor.u32 %v722_v59, %v550_v61  ;;  %v617_v7 = vor.u32 %v738_v62, %v614_v63  ;;  %v720_v8 = vld [vmem:[%s1105_s3 + $0x24] sm:$0xf]  ;;  %v542_v9 = vld [vmem:[%s1105_s3 + $0x28] sm:$0xf0]  ;;  %v541_v10 = vor.u32 %v721_v3, %v540_v2  ;;  %v605_v11 = vor.u32 %v737_v5, %v604_v4 }
  0x15   :  { %322 = vmatpush.bf16.msrb.mxu1 %v625_v60  ;;  %v736_v12 = vld [vmem:[%s1105_s3 + $0xa4] sm:$0xf]  ;;  %v606_v13 = vld [vmem:[%s1105_s3 + $0xa8] sm:$0xf0]  ;;  %v545_v14 = vor.u32 %v720_v8, %v542_v9  ;;  %v532_v16 = vld [vmem:[%s1105_s3 + $0x10] sm:$0xf] }
  0x16   :  { %284 = vmatpush.bf16.msra.mxu2 %v549_v0  ;;  %v609_v15 = vor.u32 %v736_v12, %v606_v13  ;;  %v719_v17 = vld [vmem:[%s1105_s3 + $0x14] sm:$0xf0]  ;;  %v596_v18 = vld [vmem:[%s1105_s3 + $0x90] sm:$0xf]  ;;  %v718_v21 = vld [vmem:[%s1105_s3 + $0x14] sm:$0xf] }
  0x17   :  { %297 = vmatpush.bf16.msra.mxu3 %v613_v1  ;;  %v533_v19 = vor.u32 %v719_v17, %v532_v16  ;;  %v735_v20 = vld [vmem:[%s1105_s3 + $0x94] sm:$0xf0]  ;;  %v534_v22 = vld [vmem:[%s1105_s3 + $0x18] sm:$0xf0]  ;;  %v734_v25 = vld [vmem:[%s1105_s3 + $0x94] sm:$0xf] }
  0x18   :  { %310 = vmatpush.bf16.msrb.mxu0 %v553_v6  ;;  %v597_v23 = vor.u32 %v735_v20, %v596_v18  ;;  %v537_v24 = vor.u32 %v718_v21, %v534_v22  ;;  %v598_v26 = vld [vmem:[%s1105_s3 + $0x98] sm:$0xf0]  ;;  %v524_v28 = vld [vmem:[%s1105_s3] sm:$0xf]  ;;  %v717_v29 = vld [vmem:[%s1105_s3 + $0x4] sm:$0xf0] }
  0x19   :  { %323 = vmatpush.bf16.msrb.mxu1 %v617_v7  ;;  %v601_v27 = vor.u32 %v734_v25, %v598_v26  ;;  %v588_v30 = vld [vmem:[%s1105_s3 + $0x80] sm:$0xf]  ;;  %v525_v31 = vor.u32 %v717_v29, %v524_v28  ;;  %v733_v32 = vld [vmem:[%s1105_s3 + $0x84] sm:$0xf0]  ;;  %v716_v33 = vld [vmem:[%s1105_s3 + $0x4] sm:$0xf] }
  0x1a   :  { %285 = vmatpush.bf16.msra.mxu2 %v541_v10  ;;  %v526_v34 = vld [vmem:[%s1105_s3 + $0x8] sm:$0xf0]  ;;  %v589_v35 = vor.u32 %v733_v32, %v588_v30  ;;  %v732_v37 = vld [vmem:[%s1105_s3 + $0x84] sm:$0xf]  ;;  %v763_v40 = vld [vmem:[%s1107_s5 + $0x78] sm:$0xff]  ;;  %s792_s20 = smov [#allocation2]  }
  0x1b   :  { %298 = vmatpush.bf16.msra.mxu3 %v605_v11  ;;  %v529_v36 = vor.u32 %v716_v33, %v526_v34  ;;  %v590_v38 = vld [vmem:[%s1105_s3 + $0x88] sm:$0xf0]  ;;  %v755_v41 = vld [vmem:[%s1107_s5 + $0x38] sm:$0xff]  ;;  %v762_v42 = vld [vmem:[%s1107_s5 + $0x70] sm:$0xff]  ;;  %s501_s21 = sshll.u32 %s792_s20, 4  ;;  %s503_s24 = sshll.u32 %s1109_s7, 4  ;;  %s502_s21 = int_to_ptr.vmem [resolvable:$true] %s501_s21  ;;  %s504_s24 = int_to_ptr.hbm [resolvable:$true] %s503_s24 }
  0x1c   :  { %311 = vmatpush.bf16.msrb.mxu0 %v545_v14  ;;  %v593_v39 = vor.u32 %v732_v37, %v590_v38  ;;  %v754_v43 = vld [vmem:[%s1107_s5 + $0x30] sm:$0xff]  ;;  %v761_v44 = vld [vmem:[%s1107_s5 + $0x68] sm:$0xff]  ;;  %v760_v46 = vld [vmem:[%s1107_s5 + $0x60] sm:$0xff]  ;;  %vm494_vm1 = vcmask 64512  }
  0x1d   :  { %324 = vmatpush.bf16.msrb.mxu1 %v609_v15  ;;  %v753_v45 = vld [vmem:[%s1107_s5 + $0x28] sm:$0xff]  ;;  %v752_v47 = vld [vmem:[%s1107_s5 + $0x20] sm:$0xff]  ;;  %v759_v48 = vld [vmem:[%s1107_s5 + $0x58] sm:$0xff] }
  0x1e   :  { %286 = vmatpush.bf16.msra.mxu2 %v533_v19  ;;  %v32_v49 = vld [vmem:[%s1104_s2] sm:$0x3]  ;;  %v758_v50 = vld [vmem:[%s1107_s5 + $0x50] sm:$0xff]  ;;  %v751_v63 = vld [vmem:[%s1107_s5 + $0x18] sm:$0xff] }
  0x1f   :  { %299 = vmatpush.bf16.msra.mxu3 %v597_v23  ;;  %v34_v51 = vperm.slane %v32_v49, 0  ;;  %v35_v52 = vperm.slane %v32_v49, 1  ;;  %v757_v0 = vld [vmem:[%s1107_s5 + $0x48] sm:$0xff]  ;;  %v750_v1 = vld [vmem:[%s1107_s5 + $0x10] sm:$0xff]  ;;  %v756_v2 = vld [vmem:[%s1107_s5 + $0x40] sm:$0xff] }
  0x20   :  { %312 = vmatpush.bf16.msrb.mxu0 %v537_v24  ;;  %v749_v3 = vld [vmem:[%s1107_s5 + $0x8] sm:$0xff]  ;;  %v748_v4 = vld [vmem:[%s1107_s5] sm:$0xff] }
  0x21   :  { %325 = vmatpush.bf16.msrb.mxu1 %v601_v27  ;;  %v114_v5 = vld [vmem:[%s1106_s4] sm:$0x3] }
  0x22   :  { %287 = vmatpush.bf16.msra.mxu2 %v525_v31  ;;  %v117_v6 = vperm.slane %v114_v5, 1  ;;  %v116_v11 = vperm.slane %v114_v5, 0  ;;  %v765_v25 = vld [vmem:[%s1108_s6] ss:$0 sm:$0xff] }
  0x23   :  { %300 = vmatpush.bf16.msra.mxu3 %v589_v35 }
  0x24   :  { %313 = vmatpush.bf16.msrb.mxu0 %v529_v36 }
  0x25   :  { %326 = vmatpush.bf16.msrb.mxu1 %v593_v39 }
  0x26   :  { %468 = vmatpush.bf16.msrb.mxu2 %v755_v41 }
  0x27   :  { %481 = vmatpush.bf16.msrb.mxu3 %v763_v40 }
  0x2a   :  { %469 = vmatpush.bf16.msrb.mxu2 %v754_v43 }
  0x2b   :  { %482 = vmatpush.bf16.msrb.mxu3 %v762_v42 }
  0x2e   :  { %470 = vmatpush.bf16.msrb.mxu2 %v753_v45 }
  0x2f   :  { %483 = vmatpush.bf16.msrb.mxu3 %v761_v44 }
  0x32   :  { %471 = vmatpush.bf16.msrb.mxu2 %v752_v47 }
  0x33   :  { %484 = vmatpush.bf16.msrb.mxu3 %v760_v46 }
  0x36   :  { %472 = vmatpush.bf16.msrb.mxu2 %v751_v63 }
  0x37   :  { %485 = vmatpush.bf16.msrb.mxu3 %v759_v48 }
  0x3a   :  { %473 = vmatpush.bf16.msrb.mxu2 %v750_v1 }
  0x3b   :  { %486 = vmatpush.bf16.msrb.mxu3 %v758_v50 }
  0x3e   :  { %474 = vmatpush.bf16.msrb.mxu2 %v749_v3 }
  0x3f   :  { %487 = vmatpush.bf16.msrb.mxu3 %v757_v0 }
  0x42   :  { %475 = vmatpush.bf16.msrb.mxu2 %v748_v4 }
  0x43   :  { %488 = vmatpush.bf16.msrb.mxu3 %v756_v2 }
  0x84   :  { %v61_v53 = vpop.f32.mrf.mxu0 }
  0x85   :  { %v62_v54 = vadd.f32 %v61_v53, %v34_v51  ;;  %v74_v55 = vpop.f32.mrf.mxu1 }
  0x86   :  { %v75_v56 = vadd.f32 %v74_v55, %v35_v52 }
  0x87   :  { %v78_v57 = vmax.f32 %v62_v54, 0.0 }
  0x88   :  { %v79_v58 = vmax.f32 %v75_v56, 0.0 }
  0x89   :  { %v80_v59 = vpack.c.bf16 %v78_v57, %v78_v57 }
  0x8a   :  { %v81_v60 = vpack.c.bf16 %v79_v58, %v79_v58 }
  0x8b   :  { %288 = vmatmul.bf16.vlgmr.msra.gmra.mxu2 %v80_v59  ;;  %314 = vmatmul.bf16.vlgmr.msrb.gmra.mxu0 %v80_v59 }
  0x8c   :  { %301 = vmatmul.bf16.vlgmr.msra.gmra.mxu3 %v81_v60  ;;  %327 = vmatmul.bf16.vlgmr.msrb.gmra.mxu1 %v81_v60  ;;  %v63_v61 = vpop.f32.mrf.mxu0 }
  0x8d   :  { %v76_v62 = vpop.f32.mrf.mxu1 }
 0x108   :  { %v315_v7 = vpop.f32.mrf.mxu0 }
 0x109   :  { %v316_v8 = vadd.f32 %v315_v7, %v117_v6  ;;  %v328_v9 = vpop.f32.mrf.mxu1 }
 0x10b   :  { %v329_v10 = vadd.f32 %v328_v9, %v316_v8 }
 0x10d   :  { %v333_v12 = vmax.f32 %v329_v10, 0.0 }
 0x10e   :  { %v289_v13 = vpop.f32.mrf.mxu2 }
 0x10f   :  { %v335_v14 = vpack.c.bf16 %v333_v12, %v333_v12  ;;  %v290_v15 = vadd.f32 %v289_v13, %v116_v11  ;;  %v302_v16 = vpop.f32.mrf.mxu3 }
 0x110   :  { %v317_v17 = vpop.f32.mrf.mxu0 }
 0x111   :  { %v303_v18 = vadd.f32 %v302_v16, %v290_v15  ;;  %v330_v19 = vpop.f32.mrf.mxu1  ;;  %489 = vmatmul.bf16.vlgmr.msrb.gmra.mxu3 %v335_v14 }
 0x113   :  { %v332_v20 = vmax.f32 %v303_v18, 0.0 }
 0x115   :  { %v334_v21 = vpack.c.bf16 %v332_v20, %v332_v20 }
 0x116   :  { %v291_v22 = vpop.f32.mrf.mxu2 }
 0x117   :  { %v304_v23 = vpop.f32.mrf.mxu3  ;;  %476 = vmatmul.bf16.vlgmr.msrb.gmra.mxu2 %v334_v21 }
 0x194   :  { %v490_v24 = vpop.f32.mrf.mxu3 }
 0x19a   :  { %v477_v26 = vpop.f32.mrf.mxu2 }
 0x19b   :  { %v478_v27 = vadd.f32 %v765_v25, %v477_v26 }
 0x19c   :  { %v492_v28 = vpop.f32.mrf.mxu3 }
 0x19d   :  { %v491_v29 = vadd.f32 %v490_v24, %v478_v27 }
 0x19f   :  { %495 = vst.msk [vmem:[#allocation2] sm:$0xff] %vm494_vm1, %v491_v29 }
 0x1a0   :  { %506 = dma.vmem_to_hbm [thread:$0]  %s502_s21, 128, %s504_s24, [#allocation3]  }
 0x1a2   :  { %v479_v30 = vpop.f32.mrf.mxu2 }
 0x1a3   :  { %790 = dma.done.wait [#allocation3], 128  }
 0x1a4   :  { %791 = vsyncadd [#allocation3], 4294967168 }
 0x1a5   :  { %511 = vsyncpa [#allocation3], 1 }

</bundles_post_ra>
